<compile_context>
chip_gen: v7x
topology: tpu7x:2x2x1
jax: 0.10.0
libtpu: 0.0.40
codegen_flags: <defaults>
</compile_context>

<pallas_src>
import math

import jax
import jax.numpy as jnp
from jax import lax
from jax.experimental import pallas as pl
from jax.experimental.pallas import tpu as pltpu


def _out_len(L, k, s, p):
    return (L + 2 * p - k) // s + 1


# ------------------------- fused Pallas kernel ----------------------------- #
def _make_fused_encoder_kernel(L, in_dim, h_dim):
    K1, S1 = 4, 2
    K2, S2 = 4, 2
    K3, S3 = 3, 1
    C0, C1, C2 = in_dim, h_dim // 2, h_dim
    L1 = _out_len(L, K1, S1, 1)
    L2 = _out_len(L1, K2, S2, 1)
    L3 = _out_len(L2, K3, S3, 1)

    def kernel(x_ref, w1_ref, b1_ref, w2_ref, b2_ref, w3_ref, b3_ref,
               o_ref, h1_ref, h2_ref):
        # x_ref : (L+2, C0)  zero-padded input sequence, channels-last
        # wN_ref: (K, C_in, C_out)   bN_ref: (1, C_out)
        # h1_ref: (L1+2, C1) VMEM scratch (padded layer-1 activations)
        # h2_ref: (L2+2, C2) VMEM scratch (padded layer-2 activations)
        # o_ref : (L3, C2)

        # ---- layer 1: conv(k=4, s=2, p=1) + ReLU --------------------------
        acc1 = jnp.dot(x_ref[pl.ds(0, L1, S1), :], w1_ref[0],
                       preferred_element_type=jnp.float32)
        for k in range(1, K1):
            acc1 = acc1 + jnp.dot(x_ref[pl.ds(k, L1, S1), :], w1_ref[k],
                                  preferred_element_type=jnp.float32)
        h1 = jnp.maximum(acc1 + b1_ref[...], 0.0)

        h1_ref[...] = jnp.zeros_like(h1_ref)        # zero halo rows
        h1_ref[pl.ds(1, L1), :] = h1                # interior = activations

        # ---- layer 2: conv(k=4, s=2, p=1) + ReLU --------------------------
        acc2 = jnp.dot(h1_ref[pl.ds(0, L2, S2), :], w2_ref[0],
                       preferred_element_type=jnp.float32)
        for k in range(1, K2):
            acc2 = acc2 + jnp.dot(h1_ref[pl.ds(k, L2, S2), :], w2_ref[k],
                                  preferred_element_type=jnp.float32)
        h2 = jnp.maximum(acc2 + b2_ref[...], 0.0)

        h2_ref[...] = jnp.zeros_like(h2_ref)
        h2_ref[pl.ds(1, L2), :] = h2

        # ---- layer 3: conv(k=3, s=1, p=1) + ReLU --------------------------
        acc3 = jnp.dot(h2_ref[pl.ds(0, L3), :], w3_ref[0],
                       preferred_element_type=jnp.float32)
        for k in range(1, K3):
            acc3 = acc3 + jnp.dot(h2_ref[pl.ds(k, L3), :], w3_ref[k],
                                  preferred_element_type=jnp.float32)
        o_ref[...] = jnp.maximum(acc3 + b3_ref[...], 0.0).astype(o_ref.dtype)

    return kernel, (L1, L2, L3, C0, C1, C2)


# ------------------------------ wrapper ------------------------------------ #
def encoder_forward(x, params):
    """x: (N, C_in, L) -> (N, h_dim, L_out) with PyTorch Conv1d semantics."""
    (w1, b1), (w2, b2), (w3, b3) = params
    N, C0, L = x.shape
    h_dim = w3.shape[0]

    kernel, (L1, L2, L3, _, C1, C2) = _make_fused_encoder_kernel(L, C0, h_dim)
    Lp = L + 2

    # One layout change in: (N, C, L) -> (N, L, C), pad L once for layer 1.
    x_nlc = jnp.transpose(x, (0, 2, 1)).astype(jnp.float32)
    x_pad = jnp.pad(x_nlc, ((0, 0), (1, 1), (0, 0)))          # (N, L+2, C0)

    # Weights (C_out, C_in, K) -> (K, C_in, C_out); biases -> (1, C_out).
    def prep(w, b):
        return (jnp.transpose(w, (2, 1, 0)).astype(jnp.float32),
                b.reshape(1, -1).astype(jnp.float32))

    w1t, b1t = prep(w1, b1)
    w2t, b2t = prep(w2, b2)
    w3t, b3t = prep(w3, b3)

    out_nlc = pl.pallas_call(
        kernel,
        out_shape=jax.ShapeDtypeStruct((N, L3, C2), jnp.float32),
        grid=(N,),
        in_specs=[
            pl.BlockSpec((None, Lp, C0), lambda b: (b, 0, 0)),
            pl.BlockSpec(w1t.shape, lambda b: (0, 0, 0)),
            pl.BlockSpec(b1t.shape, lambda b: (0, 0)),
            pl.BlockSpec(w2t.shape, lambda b: (0, 0, 0)),
            pl.BlockSpec(b2t.shape, lambda b: (0, 0)),
            pl.BlockSpec(w3t.shape, lambda b: (0, 0, 0)),
            pl.BlockSpec(b3t.shape, lambda b: (0, 0)),
        ],
        out_specs=pl.BlockSpec((None, L3, C2), lambda b: (b, 0, 0)),
        scratch_shapes=[
            pltpu.VMEM((L1 + 2, C1), jnp.float32),
            pltpu.VMEM((L2 + 2, C2), jnp.float32),
        ],
        compiler_params=pltpu.CompilerParams(
            dimension_semantics=("parallel",)),
    )(x_pad, w1t, b1t, w2t, b2t, w3t, b3t)

    # One layout change out: (N, L_out, C) -> (N, C, L_out)  (PyTorch layout).
    return jnp.transpose(out_nlc, (0, 2, 1))


# --------------------------- parameter init -------------------------------- #
def _init_conv(key, c_out, c_in, k):
    k1, k2 = jax.random.split(key)
    bound = 1.0 / math.sqrt(c_in * k)  # PyTorch Conv1d default init bound
    w = jax.random.uniform(k1, (c_out, c_in, k), jnp.float32, -bound, bound)
    b = jax.random.uniform(k2, (c_out,), jnp.float32, -bound, bound)
    return w, b


def init_encoder_params(key, in_dim, h_dim):
    k1, k2, k3 = jax.random.split(key, 3)
    return (
        _init_conv(k1, h_dim // 2, in_dim, 4),
        _init_conv(k2, h_dim, h_dim // 2, 4),
        _init_conv(k3, h_dim, h_dim, 3),
    )


# ------------------------------ reference ----------------------------------- #
def _conv1d_ref(x, w, b, stride, padding):
    y = lax.conv_general_dilated(
        x, w, window_strides=(stride,), padding=[(padding, padding)],
        dimension_numbers=("NCW", "OIW", "NCW"),
    )
    return jnp.maximum(y + b[None, :, None], 0.0)


def encoder_ref(x, params):
    (w1, b1), (w2, b2), (w3, b3) = params
    h = _conv1d_ref(x, w1, b1, 2, 1)
    h = _conv1d_ref(h, w2, b2, 2, 1)
    h = _conv1d_ref(h, w3, b3, 1, 1)
    return h


# --------------------------------- main -------------------------------------- #
if __name__ == "__main__":
    in_dim, h_dim = 4, 32
    batch, seq = 2, 16

    key = jax.random.PRNGKey(0)
    kx, kp = jax.random.split(key)
    x = jax.random.normal(kx, (batch, in_dim, seq), dtype=jnp.float32)
    params = init_encoder_params(kp, in_dim, h_dim)

    out = jax.block_until_ready(encoder_forward(x, params))
    ref = jax.block_until_ready(encoder_ref(x, params))

    assert out.shape == (batch, h_dim, seq // 4), out.shape
    assert jnp.allclose(out, ref, atol=1e-5, rtol=1e-5)

    print("KERNEL_OK")
</pallas_src>

<mosaic_0001>
module attributes {stable_mosaic.version = 11 : i64} {
  func.func @kernel(%arg0: i32, %arg1: memref<1x18x4xf32, #tpu.memory_space<vmem>>, %arg2: memref<4x4x16xf32, #tpu.memory_space<vmem>>, %arg3: memref<1x16xf32, #tpu.memory_space<vmem>>, %arg4: memref<4x16x32xf32, #tpu.memory_space<vmem>>, %arg5: memref<1x32xf32, #tpu.memory_space<vmem>>, %arg6: memref<3x32x32xf32, #tpu.memory_space<vmem>>, %arg7: memref<1x32xf32, #tpu.memory_space<vmem>>, %arg8: memref<1x4x32xf32, #tpu.memory_space<vmem>>, %arg9: memref<10x16xf32, #tpu.memory_space<vmem>>, %arg10: memref<6x32xf32, #tpu.memory_space<vmem>>) attributes {dimension_semantics = [#tpu.dimension_semantics<parallel>], iteration_bounds = array<i64: 2>, scalar_prefetch = 0 : i64, scratch_operands = 2 : i64, tpu.core_type = #tpu.core_type<tc>, window_params = [{transform_indices = @transform_0, window_bounds = array<i64: 1, 18, 4>}, {pipeline_mode = #tpu.pipeline_mode<synchronous>, transform_indices = @transform_1, window_bounds = array<i64: 4, 4, 16>}, {pipeline_mode = #tpu.pipeline_mode<synchronous>, transform_indices = @transform_2, window_bounds = array<i64: 1, 16>}, {pipeline_mode = #tpu.pipeline_mode<synchronous>, transform_indices = @transform_3, window_bounds = array<i64: 4, 16, 32>}, {pipeline_mode = #tpu.pipeline_mode<synchronous>, transform_indices = @transform_4, window_bounds = array<i64: 1, 32>}, {pipeline_mode = #tpu.pipeline_mode<synchronous>, transform_indices = @transform_5, window_bounds = array<i64: 3, 32, 32>}, {pipeline_mode = #tpu.pipeline_mode<synchronous>, transform_indices = @transform_6, window_bounds = array<i64: 1, 32>}, {transform_indices = @transform_7, window_bounds = array<i64: 1, 4, 32>}]} {
    %c0 = arith.constant 0 : index
    %c0_0 = arith.constant 0 : index
    %c0_1 = arith.constant 0 : index
    %0 = tpu.strided_load %arg1[%c0, %c0_0, %c0_1] {strides = array<i32: 1, 2, 1>} : memref<1x18x4xf32, #tpu.memory_space<vmem>>, vector<1x8x4xf32>
    %1 = vector.shape_cast %0 : vector<1x8x4xf32> to vector<8x4xf32>
    %c0_2 = arith.constant 0 : index
    %c0_3 = arith.constant 0 : index
    %c0_4 = arith.constant 0 : index
    %2 = vector.load %arg2[%c0_2, %c0_3, %c0_4] : memref<4x4x16xf32, #tpu.memory_space<vmem>>, vector<1x4x16xf32>
    %3 = vector.shape_cast %2 : vector<1x4x16xf32> to vector<4x16xf32>
    %cst = arith.constant dense<0.000000e+00> : vector<8x16xf32>
    %4 = tpu.matmul %1, %3, %cst {dimension_numbers = #tpu.dot_dimension_numbers<[1], [0], [0], [1], [0, 0, 1, 1], [], []>} : vector<8x4xf32>, vector<4x16xf32>, vector<8x16xf32> -> vector<8x16xf32>
    %c0_5 = arith.constant 0 : index
    %c1 = arith.constant 1 : index
    %c0_6 = arith.constant 0 : index
    %5 = tpu.strided_load %arg1[%c0_5, %c1, %c0_6] {strides = array<i32: 1, 2, 1>} : memref<1x18x4xf32, #tpu.memory_space<vmem>>, vector<1x8x4xf32>
    %6 = vector.shape_cast %5 : vector<1x8x4xf32> to vector<8x4xf32>
    %c1_7 = arith.constant 1 : index
    %c0_8 = arith.constant 0 : index
    %c0_9 = arith.constant 0 : index
    %7 = vector.load %arg2[%c1_7, %c0_8, %c0_9] : memref<4x4x16xf32, #tpu.memory_space<vmem>>, vector<1x4x16xf32>
    %8 = vector.shape_cast %7 : vector<1x4x16xf32> to vector<4x16xf32>
    %cst_10 = arith.constant dense<0.000000e+00> : vector<8x16xf32>
    %9 = tpu.matmul %6, %8, %cst_10 {dimension_numbers = #tpu.dot_dimension_numbers<[1], [0], [0], [1], [0, 0, 1, 1], [], []>} : vector<8x4xf32>, vector<4x16xf32>, vector<8x16xf32> -> vector<8x16xf32>
    %10 = arith.addf %4, %9 : vector<8x16xf32>
    %c0_11 = arith.constant 0 : index
    %c2 = arith.constant 2 : index
    %c0_12 = arith.constant 0 : index
    %11 = tpu.strided_load %arg1[%c0_11, %c2, %c0_12] {strides = array<i32: 1, 2, 1>} : memref<1x18x4xf32, #tpu.memory_space<vmem>>, vector<1x8x4xf32>
    %12 = vector.shape_cast %11 : vector<1x8x4xf32> to vector<8x4xf32>
    %c2_13 = arith.constant 2 : index
    %c0_14 = arith.constant 0 : index
    %c0_15 = arith.constant 0 : index
    %13 = vector.load %arg2[%c2_13, %c0_14, %c0_15] : memref<4x4x16xf32, #tpu.memory_space<vmem>>, vector<1x4x16xf32>
    %14 = vector.shape_cast %13 : vector<1x4x16xf32> to vector<4x16xf32>
    %cst_16 = arith.constant dense<0.000000e+00> : vector<8x16xf32>
    %15 = tpu.matmul %12, %14, %cst_16 {dimension_numbers = #tpu.dot_dimension_numbers<[1], [0], [0], [1], [0, 0, 1, 1], [], []>} : vector<8x4xf32>, vector<4x16xf32>, vector<8x16xf32> -> vector<8x16xf32>
    %16 = arith.addf %10, %15 : vector<8x16xf32>
    %c0_17 = arith.constant 0 : index
    %c3 = arith.constant 3 : index
    %c0_18 = arith.constant 0 : index
    %17 = tpu.strided_load %arg1[%c0_17, %c3, %c0_18] {strides = array<i32: 1, 2, 1>} : memref<1x18x4xf32, #tpu.memory_space<vmem>>, vector<1x8x4xf32>
    %18 = vector.shape_cast %17 : vector<1x8x4xf32> to vector<8x4xf32>
    %c3_19 = arith.constant 3 : index
    %c0_20 = arith.constant 0 : index
    %c0_21 = arith.constant 0 : index
    %19 = vector.load %arg2[%c3_19, %c0_20, %c0_21] : memref<4x4x16xf32, #tpu.memory_space<vmem>>, vector<1x4x16xf32>
    %20 = vector.shape_cast %19 : vector<1x4x16xf32> to vector<4x16xf32>
    %cst_22 = arith.constant dense<0.000000e+00> : vector<8x16xf32>
    %21 = tpu.matmul %18, %20, %cst_22 {dimension_numbers = #tpu.dot_dimension_numbers<[1], [0], [0], [1], [0, 0, 1, 1], [], []>} : vector<8x4xf32>, vector<4x16xf32>, vector<8x16xf32> -> vector<8x16xf32>
    %22 = arith.addf %16, %21 : vector<8x16xf32>
    %c0_23 = arith.constant 0 : index
    %c0_24 = arith.constant 0 : index
    %23 = vector.load %arg3[%c0_23, %c0_24] : memref<1x16xf32, #tpu.memory_space<vmem>>, vector<1x16xf32>
    %24 = vector.broadcast %23 : vector<1x16xf32> to vector<8x16xf32>
    %25 = arith.addf %22, %24 : vector<8x16xf32>
    %cst_25 = arith.constant 0.000000e+00 : f32
    %26 = vector.broadcast %cst_25 : f32 to vector<8x16xf32>
    %27 = arith.maximumf %25, %26 : vector<8x16xf32>
    %cst_26 = arith.constant 0.000000e+00 : f32
    %28 = vector.broadcast %cst_26 : f32 to vector<10x16xf32>
    %c0_27 = arith.constant 0 : index
    %c0_28 = arith.constant 0 : index
    %29 = vector.load %arg9[%c0_27, %c0_28] : memref<10x16xf32, #tpu.memory_space<vmem>>, vector<10x16xf32>
    tpu.vector_store %arg9[%c0_27, %c0_28], %28 {strides = array<i32>} : memref<10x16xf32, #tpu.memory_space<vmem>>, vector<10x16xf32>,
    %c1_29 = arith.constant 1 : index
    %c0_30 = arith.constant 0 : index
    %30 = vector.load %arg9[%c1_29, %c0_30] : memref<10x16xf32, #tpu.memory_space<vmem>>, vector<8x16xf32>
    tpu.vector_store %arg9[%c1_29, %c0_30], %27 {strides = array<i32>} : memref<10x16xf32, #tpu.memory_space<vmem>>, vector<8x16xf32>,
    %c0_31 = arith.constant 0 : index
    %c0_32 = arith.constant 0 : index
    %31 = tpu.strided_load %arg9[%c0_31, %c0_32] {strides = array<i32: 2, 1>} : memref<10x16xf32, #tpu.memory_space<vmem>>, vector<4x16xf32>
    %c0_33 = arith.constant 0 : index
    %c0_34 = arith.constant 0 : index
    %c0_35 = arith.constant 0 : index
    %32 = vector.load %arg4[%c0_33, %c0_34, %c0_35] : memref<4x16x32xf32, #tpu.memory_space<vmem>>, vector<1x16x32xf32>
    %33 = vector.shape_cast %32 : vector<1x16x32xf32> to vector<16x32xf32>
    %cst_36 = arith.constant dense<0.000000e+00> : vector<4x32xf32>
    %34 = tpu.matmul %31, %33, %cst_36 {dimension_numbers = #tpu.dot_dimension_numbers<[1], [0], [0], [1], [0, 0, 1, 1], [], []>} : vector<4x16xf32>, vector<16x32xf32>, vector<4x32xf32> -> vector<4x32xf32>
    %c1_37 = arith.constant 1 : index
    %c0_38 = arith.constant 0 : index
    %35 = tpu.strided_load %arg9[%c1_37, %c0_38] {strides = array<i32: 2, 1>} : memref<10x16xf32, #tpu.memory_space<vmem>>, vector<4x16xf32>
    %c1_39 = arith.constant 1 : index
    %c0_40 = arith.constant 0 : index
    %c0_41 = arith.constant 0 : index
    %36 = vector.load %arg4[%c1_39, %c0_40, %c0_41] : memref<4x16x32xf32, #tpu.memory_space<vmem>>, vector<1x16x32xf32>
    %37 = vector.shape_cast %36 : vector<1x16x32xf32> to vector<16x32xf32>
    %cst_42 = arith.constant dense<0.000000e+00> : vector<4x32xf32>
    %38 = tpu.matmul %35, %37, %cst_42 {dimension_numbers = #tpu.dot_dimension_numbers<[1], [0], [0], [1], [0, 0, 1, 1], [], []>} : vector<4x16xf32>, vector<16x32xf32>, vector<4x32xf32> -> vector<4x32xf32>
    %39 = arith.addf %34, %38 : vector<4x32xf32>
    %c2_43 = arith.constant 2 : index
    %c0_44 = arith.constant 0 : index
    %40 = tpu.strided_load %arg9[%c2_43, %c0_44] {strides = array<i32: 2, 1>} : memref<10x16xf32, #tpu.memory_space<vmem>>, vector<4x16xf32>
    %c2_45 = arith.constant 2 : index
    %c0_46 = arith.constant 0 : index
    %c0_47 = arith.constant 0 : index
    %41 = vector.load %arg4[%c2_45, %c0_46, %c0_47] : memref<4x16x32xf32, #tpu.memory_space<vmem>>, vector<1x16x32xf32>
    %42 = vector.shape_cast %41 : vector<1x16x32xf32> to vector<16x32xf32>
    %cst_48 = arith.constant dense<0.000000e+00> : vector<4x32xf32>
    %43 = tpu.matmul %40, %42, %cst_48 {dimension_numbers = #tpu.dot_dimension_numbers<[1], [0], [0], [1], [0, 0, 1, 1], [], []>} : vector<4x16xf32>, vector<16x32xf32>, vector<4x32xf32> -> vector<4x32xf32>
    %44 = arith.addf %39, %43 : vector<4x32xf32>
    %c3_49 = arith.constant 3 : index
    %c0_50 = arith.constant 0 : index
    %45 = tpu.strided_load %arg9[%c3_49, %c0_50] {strides = array<i32: 2, 1>} : memref<10x16xf32, #tpu.memory_space<vmem>>, vector<4x16xf32>
    %c3_51 = arith.constant 3 : index
    %c0_52 = arith.constant 0 : index
    %c0_53 = arith.constant 0 : index
    %46 = vector.load %arg4[%c3_51, %c0_52, %c0_53] : memref<4x16x32xf32, #tpu.memory_space<vmem>>, vector<1x16x32xf32>
    %47 = vector.shape_cast %46 : vector<1x16x32xf32> to vector<16x32xf32>
    %cst_54 = arith.constant dense<0.000000e+00> : vector<4x32xf32>
    %48 = tpu.matmul %45, %47, %cst_54 {dimension_numbers = #tpu.dot_dimension_numbers<[1], [0], [0], [1], [0, 0, 1, 1], [], []>} : vector<4x16xf32>, vector<16x32xf32>, vector<4x32xf32> -> vector<4x32xf32>
    %49 = arith.addf %44, %48 : vector<4x32xf32>
    %c0_55 = arith.constant 0 : index
    %c0_56 = arith.constant 0 : index
    %50 = vector.load %arg5[%c0_55, %c0_56] : memref<1x32xf32, #tpu.memory_space<vmem>>, vector<1x32xf32>
    %51 = vector.broadcast %50 : vector<1x32xf32> to vector<4x32xf32>
    %52 = arith.addf %49, %51 : vector<4x32xf32>
    %cst_57 = arith.constant 0.000000e+00 : f32
    %53 = vector.broadcast %cst_57 : f32 to vector<4x32xf32>
    %54 = arith.maximumf %52, %53 : vector<4x32xf32>
    %cst_58 = arith.constant 0.000000e+00 : f32
    %55 = vector.broadcast %cst_58 : f32 to vector<6x32xf32>
    %c0_59 = arith.constant 0 : index
    %c0_60 = arith.constant 0 : index
    %56 = vector.load %arg10[%c0_59, %c0_60] : memref<6x32xf32, #tpu.memory_space<vmem>>, vector<6x32xf32>
    tpu.vector_store %arg10[%c0_59, %c0_60], %55 {strides = array<i32>} : memref<6x32xf32, #tpu.memory_space<vmem>>, vector<6x32xf32>,
    %c1_61 = arith.constant 1 : index
    %c0_62 = arith.constant 0 : index
    %57 = vector.load %arg10[%c1_61, %c0_62] : memref<6x32xf32, #tpu.memory_space<vmem>>, vector<4x32xf32>
    tpu.vector_store %arg10[%c1_61, %c0_62], %54 {strides = array<i32>} : memref<6x32xf32, #tpu.memory_space<vmem>>, vector<4x32xf32>,
    %c0_63 = arith.constant 0 : index
    %c0_64 = arith.constant 0 : index
    %58 = vector.load %arg10[%c0_63, %c0_64] : memref<6x32xf32, #tpu.memory_space<vmem>>, vector<4x32xf32>
    %c0_65 = arith.constant 0 : index
    %c0_66 = arith.constant 0 : index
    %c0_67 = arith.constant 0 : index
    %59 = vector.load %arg6[%c0_65, %c0_66, %c0_67] : memref<3x32x32xf32, #tpu.memory_space<vmem>>, vector<1x32x32xf32>
    %60 = vector.shape_cast %59 : vector<1x32x32xf32> to vector<32x32xf32>
    %cst_68 = arith.constant dense<0.000000e+00> : vector<4x32xf32>
    %61 = tpu.matmul %58, %60, %cst_68 {dimension_numbers = #tpu.dot_dimension_numbers<[1], [0], [0], [1], [0, 0, 1, 1], [], []>} : vector<4x32xf32>, vector<32x32xf32>, vector<4x32xf32> -> vector<4x32xf32>
    %c1_69 = arith.constant 1 : index
    %c0_70 = arith.constant 0 : index
    %62 = vector.load %arg10[%c1_69, %c0_70] : memref<6x32xf32, #tpu.memory_space<vmem>>, vector<4x32xf32>
    %c1_71 = arith.constant 1 : index
    %c0_72 = arith.constant 0 : index
    %c0_73 = arith.constant 0 : index
    %63 = vector.load %arg6[%c1_71, %c0_72, %c0_73] : memref<3x32x32xf32, #tpu.memory_space<vmem>>, vector<1x32x32xf32>
    %64 = vector.shape_cast %63 : vector<1x32x32xf32> to vector<32x32xf32>
    %cst_74 = arith.constant dense<0.000000e+00> : vector<4x32xf32>
    %65 = tpu.matmul %62, %64, %cst_74 {dimension_numbers = #tpu.dot_dimension_numbers<[1], [0], [0], [1], [0, 0, 1, 1], [], []>} : vector<4x32xf32>, vector<32x32xf32>, vector<4x32xf32> -> vector<4x32xf32>
    %66 = arith.addf %61, %65 : vector<4x32xf32>
    %c2_75 = arith.constant 2 : index
    %c0_76 = arith.constant 0 : index
    %67 = vector.load %arg10[%c2_75, %c0_76] : memref<6x32xf32, #tpu.memory_space<vmem>>, vector<4x32xf32>
    %c2_77 = arith.constant 2 : index
    %c0_78 = arith.constant 0 : index
    %c0_79 = arith.constant 0 : index
    %68 = vector.load %arg6[%c2_77, %c0_78, %c0_79] : memref<3x32x32xf32, #tpu.memory_space<vmem>>, vector<1x32x32xf32>
    %69 = vector.shape_cast %68 : vector<1x32x32xf32> to vector<32x32xf32>
    %cst_80 = arith.constant dense<0.000000e+00> : vector<4x32xf32>
    %70 = tpu.matmul %67, %69, %cst_80 {dimension_numbers = #tpu.dot_dimension_numbers<[1], [0], [0], [1], [0, 0, 1, 1], [], []>} : vector<4x32xf32>, vector<32x32xf32>, vector<4x32xf32> -> vector<4x32xf32>
    %71 = arith.addf %66, %70 : vector<4x32xf32>
    %c0_81 = arith.constant 0 : index
    %c0_82 = arith.constant 0 : index
    %72 = vector.load %arg7[%c0_81, %c0_82] : memref<1x32xf32, #tpu.memory_space<vmem>>, vector<1x32xf32>
    %73 = vector.broadcast %72 : vector<1x32xf32> to vector<4x32xf32>
    %74 = arith.addf %71, %73 : vector<4x32xf32>
    %cst_83 = arith.constant 0.000000e+00 : f32
    %75 = vector.broadcast %cst_83 : f32 to vector<4x32xf32>
    %76 = arith.maximumf %74, %75 : vector<4x32xf32>
    %c0_84 = arith.constant 0 : index
    %c0_85 = arith.constant 0 : index
    %c0_86 = arith.constant 0 : index
    %77 = vector.load %arg8[%c0_84, %c0_85, %c0_86] : memref<1x4x32xf32, #tpu.memory_space<vmem>>, vector<1x4x32xf32>
    %78 = vector.shape_cast %77 : vector<1x4x32xf32> to vector<4x32xf32>
    %79 = vector.shape_cast %76 : vector<4x32xf32> to vector<1x4x32xf32>
    tpu.vector_store %arg8[%c0_84, %c0_85, %c0_86], %79 {strides = array<i32>} : memref<1x4x32xf32, #tpu.memory_space<vmem>>, vector<1x4x32xf32>,
    return
  }
  func.func @transform_0(%arg0: i32) -> (i32, i32, i32) {
    %c0_i32 = arith.constant 0 : i32
    %c0_i32_0 = arith.constant 0 : i32
    %c0_i32_1 = arith.constant 0 : i32
    return %arg0, %c0_i32, %c0_i32_0 : i32, i32, i32
  }
  func.func @transform_1(%arg0: i32) -> (i32, i32, i32) {
    %c0_i32 = arith.constant 0 : i32
    %c0_i32_0 = arith.constant 0 : i32
    %c0_i32_1 = arith.constant 0 : i32
    %c0_i32_2 = arith.constant 0 : i32
    return %c0_i32, %c0_i32_0, %c0_i32_1 : i32, i32, i32
  }
  func.func @transform_2(%arg0: i32) -> (i32, i32) {
    %c0_i32 = arith.constant 0 : i32
    %c0_i32_0 = arith.constant 0 : i32
    %c0_i32_1 = arith.constant 0 : i32
    return %c0_i32, %c0_i32_0 : i32, i32
  }
  func.func @transform_3(%arg0: i32) -> (i32, i32, i32) {
    %c0_i32 = arith.constant 0 : i32
    %c0_i32_0 = arith.constant 0 : i32
    %c0_i32_1 = arith.constant 0 : i32
    %c0_i32_2 = arith.constant 0 : i32
    return %c0_i32, %c0_i32_0, %c0_i32_1 : i32, i32, i32
  }
  func.func @transform_4(%arg0: i32) -> (i32, i32) {
    %c0_i32 = arith.constant 0 : i32
    %c0_i32_0 = arith.constant 0 : i32
    %c0_i32_1 = arith.constant 0 : i32
    return %c0_i32, %c0_i32_0 : i32, i32
  }
  func.func @transform_5(%arg0: i32) -> (i32, i32, i32) {
    %c0_i32 = arith.constant 0 : i32
    %c0_i32_0 = arith.constant 0 : i32
    %c0_i32_1 = arith.constant 0 : i32
    %c0_i32_2 = arith.constant 0 : i32
    return %c0_i32, %c0_i32_0, %c0_i32_1 : i32, i32, i32
  }
  func.func @transform_6(%arg0: i32) -> (i32, i32) {
    %c0_i32 = arith.constant 0 : i32
    %c0_i32_0 = arith.constant 0 : i32
    %c0_i32_1 = arith.constant 0 : i32
    return %c0_i32, %c0_i32_0 : i32, i32
  }
  func.func @transform_7(%arg0: i32) -> (i32, i32, i32) {
    %c0_i32 = arith.constant 0 : i32
    %c0_i32_0 = arith.constant 0 : i32
    %c0_i32_1 = arith.constant 0 : i32
    return %arg0, %c0_i32, %c0_i32_0 : i32, i32, i32
  }
}

</mosaic_0001>

<bundles_post_ra>
// kernel: tpu_custom_call.1
= control target key start
LH: loop header
LB: loop body
LE: loop exit
PB: predicated region body
PF: predicated region fallthrough
CT: control target
= control target key end

     0   :  { %12 = vsyncpa [#allocation5], 0  ;;  %s2004_s0 = inlined_call_operand.vmem [shape: f32[2,18,4], index: 0, kind: input, shape index: {}]   ;;  %s2005_s1 = inlined_call_operand.hbm [shape: f32[4,4,16], index: 1, kind: input, shape index: {}]   ;;  %s2006_s2 = inlined_call_operand.vmem [shape: f32[1,16], index: 2, kind: input, shape index: {}]   ;;  %s2007_s3 = inlined_call_operand.vmem [shape: f32[4,16,32], index: 3, kind: input, shape index: {}]   ;;  %s2008_s4 = inlined_call_operand.vmem [shape: f32[1,32], index: 4, kind: input, shape index: {}]   ;;  %s2009_s5 = inlined_call_operand.hbm [shape: f32[3,32,32], index: 5, kind: input, shape index: {}]   ;;  %s2010_s6 = inlined_call_operand.vmem [shape: f32[1,32], index: 6, kind: input, shape index: {}]   ;;  %s2011_s7 = inlined_call_operand.hbm [shape: f32[2,4,32], index: 7, kind: output, shape index: {}]  }
   0x1   :  { %13 = vsyncpa [#allocation8], 0 }
   0x2   :  { %14 = vsyncpa [#allocation6], 0 }
   0x3   :  { %16 = vsyncpa [#allocation6 + $0x1], 0  ;;  %s1744_s24 = smov 0   ;;  %s1746_s25 = smov 0  }
   0x4   :  { %s1748_s26 = smov 0   ;;  %s1750_s27 = smov 0  }
   0x5 LB: > { %s1765_s28 = sadd.s32 4294967295, %s1692_s27   ;;  %s1311_s29 = sadd.s32 4294967294, %s1692_s27   ;;  %s1692_s27 = sphi %s1750_s27, %s2031_s27   ;;  %s1688_s26 = sphi %s1748_s26, %s2030_s26   ;;  %s1684_s25 = sphi %s1746_s25, %s2029_s25   ;;  %s1680_s24 = sphi %s1744_s24, %s2028_s24  }
   0x6   : > { %s1769_s30 = sadd.s32 1, %s1692_s27   ;;  %s181_s8 = sadd.s32 1, %s1688_s26 }
   0x7   : > { %s178_s9 = ssub.s32 %s1692_s27, %s1769_s30  ;;  %p191_p0 = scmp.ne.s32.totalorder %s1688_s26, %s1684_s25 }
   0x8   : > { %p179_p1 = scmp.eq.s32.totalorder %s178_s9, 0  ;;  %p192_p2 = scmp.eq.s32.totalorder %s1765_s28, 1 }
   0x9   : > { %p197_p3 = scmp.ne.s32.totalorder %s1684_s25, %s1680_s24  ;;  %p198_p4 = scmp.eq.s32.totalorder %s1311_s29, 1 }
   0xa   : > { %s1780_s10 = scalar_select %p179_p1, %s1688_s26, %s181_s8  }
   0xb   : > { %p1782_p5 = por %p192_p2, %p191_p0  ;;  %p1786_p6 = por %p198_p4, %p197_p3 }
   0xc   : > { %2015 = sst [smem:[#allocation13_spill]] %s1780_s10  ;;  %p1312_p7 = scmp.ge.s32.totalorder %s1692_s27, 1 }
   0xd   : > { %s2016_s11 = scalar_select %p1782_p5, 1, 0 }
   0xe   : > { %s2017_s12 = scalar_select %p1786_p6, 1, 0 }
   0xf   : > { %p205_p8 = scmp.lt.s32.totalorder %s1692_s27, 3  ;;  %p2012_p9 = scmp.eq.s32.totalorder %s1765_s28, 0 }
  0x10   : > { %s1694_s14 = smov [#allocation4]   ;;  %s1695_s17 = smov [#allocation7]  }
  0x11   : > { %p1793_p10 = pnand %p1312_p7, %p205_p8  ;;  %s217_s15 = sshll.u32 %s1694_s14, 4  ;;  %s218_s15 = int_to_ptr.vmem [resolvable:$true] %s217_s15 }
  0x12   : > { %s239_s18 = sshll.u32 %s1695_s17, 4  ;;  %s1566_s21 = scalar_lea.hbm %s2005_s1, 256  ;;  %s1805_s18 = int_to_ptr.vmem [resolvable:$true] %s239_s18 }
  0x13   : > { %s2018_s13 = scalar_select %p1793_p10, 1, 0 }
  0x14   : > { %p1509_p11 = pneg %p1793_p10  ;;  %p1567_p13 = scmp.ne.s32.totalorder %s2005_s1, %s1566_s21 }
  0x15   : > { %p1573_p3 = scmp.lt.u32.totalorder %s1566_s21, %s2005_s1 }
  0x16   : > { %p1801_p12 = pnand %p2012_p9, %p1509_p11 }
  0x18   : > { %p1568_p0 = pneg %p1801_p12 }
  0x1a   : > { %p1569_p1 = pnand %p1568_p0, %p1567_p13 }
  0x1c   : > { %p1570_p2 = pneg %p1569_p1 }
  0x1e   : > { %p1575_p4 = pnand %p1573_p3, %p1570_p2 }
  0x20   : > { %1578 = shalt.err (!%p1575_p4)
}
  0x21   : > { %s1579_s9 = scalar_lea.vmem %s218_s15, 256  ;;  %p1587_p9 = scmp.lt.s32.totalorder %s218_s15, %s218_s15 }
  0x22   : > { %p1580_p7 = scmp.ne.s32.totalorder %s218_s15, %s1579_s9  ;;  %p1588_p6 = scmp.lt.s32.totalorder %s1579_s9, %s1579_s9 }
  0x24   : > { %p1582_p8 = pnand %p1580_p7, %p1568_p0  ;;  %p1589_p5 = por %p1588_p6, %p1587_p9 }
  0x26   : > { %p1583_p11 = pneg %p1582_p8 }
  0x28   : > { %p1590_p10 = pnand %p1589_p5, %p1583_p11 }
  0x2a   : > { %1593 = shalt.err (!%p1590_p10)
}
  0x2b   : > { %s1696_s14 = smov 64   ;;  %s1697_s17 = smov 4  }
  0x2c   : > { %1512 = dma.hbm_to_vmem [thread:$0]  (!%p1801_p12), %s2005_s1, 256, %s218_s15, [#allocation5], %s1696_s14, %s1696_s14, %s1697_s17  }
  0x2d   : > { %s1594_s23 = scalar_lea.hbm %s2009_s5, 1536 }
  0x2e   : > { %p1595_p13 = scmp.ne.s32.totalorder %s2009_s5, %s1594_s23  ;;  %p1601_p9 = scmp.lt.u32.totalorder %s1594_s23, %s2009_s5 }
  0x30   : > { %p1597_p5 = pnand %p1595_p13, %p1568_p0 }
  0x32   : > { %p1598_p6 = pneg %p1597_p5 }
  0x34   : > { %p1603_p10 = pnand %p1601_p9, %p1598_p6 }
  0x36   : > { %1606 = shalt.err (!%p1603_p10)
}
  0x37   : > { %s1607_s15 = scalar_lea.vmem %s1805_s18, 1536  ;;  %p1615_p4 = scmp.lt.s32.totalorder %s1805_s18, %s1805_s18 }
  0x38   : > { %p1608_p1 = scmp.ne.s32.totalorder %s1805_s18, %s1607_s15  ;;  %p1616_p7 = scmp.lt.s32.totalorder %s1607_s15, %s1607_s15 }
  0x3a   : > { %p1610_p2 = pnand %p1608_p1, %p1568_p0  ;;  %p1617_p8 = por %p1616_p7, %p1615_p4 }
  0x3c   : > { %p1611_p3 = pneg %p1610_p2 }
  0x3e   : > { %p1618_p11 = pnand %p1617_p8, %p1611_p3 }
  0x40   : > { %1621 = shalt.err (!%p1618_p11)
}
  0x41   : > { %s1698_s10 = smov 128   ;;  %s1699_s14 = smov 8  }
  0x42   : > { %1515 = dma.hbm_to_vmem [thread:$0]  (!%p1801_p12), %s2009_s5, 1536, %s1805_s18, [#allocation8], %s1698_s10, %s1698_s10, %s1699_s14  }
  0x43   : > { %p2020_p13 = scmp.ne.s32.totalorder %s2018_s13, 0 }
  0x44   : > { %p2021_p0 = scmp.eq.s32.totalorder (!%p2020_p13), %s1765_s28, 0 }
  0x45   : > { %266 = sbr.rel (%p2020_p13) target bundleno = 794 (0x31a), region = 48 }
  0x4c   : > { %1667 = dma.done.wait (%p2021_p0), [#allocation5], 256   ;;  %p2022_p5 = pmov %p2021_p0 }
  0x4d   : > { %p2023_p6 = pmov %p2021_p0 }
  0x4e   : > { %1669 = vsyncadd (%p2022_p5), [#allocation5], 4294967040 }
  0x4f   : > { %1671 = dma.done.wait (%p2023_p6), [#allocation8], 1536   ;;  %p2024_p9 = pmov %p2021_p0 }
  0x50   : > { %p302_p10 = scmp.lt.s32.totalorder %s1765_s28, 1  ;;  %v1700_v0 = vmov 0.0   ;;  %vm1701_vm0 = vmmov 0   ;;  %vm317_vm1 = vcmask 1043456   ;;  %vm313_vm2 = vcmask 31744   ;;  %v1333_v9 = vld [vmem:[%s2007_s3 + $0x10] sm:$0xff] }
  0x51   : > { %1673 = vsyncadd (%p2024_p9), [#allocation8], 4294965760  ;;  %1387 = vmatprep.subr.mxu1 %v1700_v0  ;;  %1389 = vmatprep.mubr.msk.f32.mxu1 %vm1701_vm0, %v1700_v0  ;;  %v312_v1 = vld [vmem:[#allocation4 + $0x4] sm:$0xf]  ;;  %v308_v3 = vld [vmem:[#allocation4] sm:$0xf] }
  0x52   : > { %s303_s13 = scalar_select %p302_p10, %s1765_s28, 1  ;;  %1397 = vmatprep.subr.mxu0 %v1700_v0  ;;  %1399 = vmatprep.mubr.msk.f32.mxu0 %vm1701_vm0, %v1700_v0  ;;  %v470_v4 = vld [vmem:[#allocation4 + $0x8] sm:$0xf]  ;;  %v551_v7 = vld [vmem:[#allocation4 + $0xc] sm:$0xf]  ;;  %v1334_v10 = vld [vmem:[%s2007_s3 + $0x18] sm:$0xff] }
  0x53   : > { %1388 = vmatpush3.msk.msra.mxu1 %vm317_vm1, %v312_v1  ;;  %1398 = vmatpush3.msk.msra.mxu0 %vm317_vm1, %v470_v4  ;;  %v644_v11 = vld [vmem:[%s2007_s3] sm:$0xff]  ;;  %vm638_vm3 = vcmask 130048   ;;  %vm640_vm4 = vcmask 123904   ;;  %v1702_v12 = vmov 0.0|0.0   ;;  %v1469_v13 = vpack.c.bf16 %v1334_v10, %v1333_v9  ;;  %v645_v14 = vld [vmem:[%s2007_s3 + $0x8] sm:$0xff]  ;;  %v1340_v32 = vld [vmem:[%s2007_s3 + $0x30] sm:$0xff] }
  0x54   : > { %s1498_s16 = smul.u32 24, %s303_s13  ;;  %1392 = vmatprep.subr.mxu1 %v1700_v0  ;;  %1468 = vmatprep.subr.bf16.mxu0 %v1702_v12  ;;  %639 = vst.msk [vmem:[#allocation2] sm:$0xff] %vm638_vm3, %v1700_v0  ;;  %v1472_v15 = vpack.c.bf16 %v645_v14, %v644_v11  ;;  %v1332_v25 = vld [vmem:[%s2006_s2] ss:$0 sm:$0xff]  ;;  %v1338_v31 = vld [vmem:[%s2007_s3 + $0x28] sm:$0xff]  ;;  %v1341_v33 = vld [vmem:[%s2007_s3 + $0x38] sm:$0xff] }
  0x55   : > { %641 = vst.msk [vmem:[#allocation2 + $0x8] sm:$0x3] %vm640_vm4, %v1700_v0  ;;  %v1337_v30 = vld [vmem:[%s2007_s3 + $0x20] sm:$0xff]  ;;  %v1478_v35 = vpack.c.bf16 %v1341_v33, %v1340_v32  ;;  %vm964_vm5 = vcmask 259072   ;;  %v975_v40 = vld [vmem:[#allocation7 + $0x20] sm:$0xff]  ;;  %v976_v41 = vld [vmem:[#allocation7 + $0x28] sm:$0xff] }
  0x56   : > { %s306_s21 = scalar_lea.vmem %s2004_s0, %s1498_s16  ;;  %v1475_v34 = vpack.c.bf16 %v1338_v31, %v1337_v30  ;;  %965 = vst.msk [vmem:[#allocation3] sm:$0x3f] %vm964_vm5, %v1700_v0  ;;  %v1481_v42 = vpack.c.bf16 %v976_v41, %v975_v40  ;;  %v969_v43 = vld [vmem:[#allocation7] sm:$0xff]  ;;  %v970_v44 = vld [vmem:[#allocation7 + $0x8] sm:$0xff]  ;;  %v977_v46 = vld [vmem:[#allocation7 + $0x30] sm:$0xff]  ;;  %vm966_vm6 = vcmask 257024  }
  0x57   : > { %v1321_v2 = vld [vmem:[%s306_s21 + $0x1] ss:$2 sm:$0xff]  ;;  %v1326_v5 = vld [vmem:[%s306_s21 + $0x2] ss:$2 sm:$0xff]  ;;  %v1487_v45 = vpack.c.bf16 %v970_v44, %v969_v43  ;;  %v971_v48 = vld [vmem:[#allocation7 + $0x10] sm:$0xff]  ;;  %vm979_vm7 = vcmask 261120  }
  0x58   : > { %1390 = vmatmul.mubr.msk.f32.vlgmr.msra.gmra.mrb[0].mxu1 %vm313_vm2, %v1321_v2  ;;  %v307_v6 = vld [vmem:[%s306_s21] ss:$2 sm:$0xff]  ;;  %1400 = vmatmul.mubr.msk.f32.vlgmr.msra.gmra.mrb[0].mxu0 %vm313_vm2, %v1326_v5  ;;  %v1329_v8 = vld [vmem:[%s306_s21 + $0x3] ss:$2 sm:$0xff]  ;;  %s299_s15 = sand.u32 1, %s1684_s25   ;;  %s1349_s19 = sshll.u32 %s1765_s28, 6 }
  0x59   : > { %1393 = vmatpush3.msk.msra.mxu1 %vm317_vm1, %v308_v3  ;;  %1394 = vmatprep.mubr.msk.f32.mxu1 %vm1701_vm0, %v1700_v0  ;;  %v978_v47 = vld [vmem:[#allocation7 + $0x38] sm:$0xff]  ;;  %v1128_v3 = vld [vmem:[#allocation7 + $0x40] sm:$0xff]  ;;  %v1129_v4 = vld [vmem:[#allocation7 + $0x48] sm:$0xff]  ;;  %s1319_s10 = sshll.u32 %s299_s15, 2  ;;  %s1961_s21 = scalar_lea.hbm %s2011_s7, %s1349_s19 }
  0x5a   : > { %1402 = vmatprep.subr.mxu1 %v1700_v0  ;;  %1411 = vmatprep.mubr.msk.f32.mxu0 %vm1701_vm0, %v1700_v0  ;;  %v1484_v49 = vpack.c.bf16 %v978_v47, %v977_v46  ;;  %v972_v50 = vld [vmem:[#allocation7 + $0x18] sm:$0xff]  ;;  %v1493_v5 = vpack.c.bf16 %v1129_v4, %v1128_v3  ;;  %s301_s13 = scalar_lea.vmem [#allocation9], %s1319_s10  ;;  %s1217_s22 = scalar_lea.sflag [#allocation6], %s299_s15 }
  0x5b   : > { %1470 = vmatpush3.bf16.msra.mxu0 %v1469_v13  ;;  %v1490_v51 = vpack.c.bf16 %v972_v50, %v971_v48  ;;  %v1343_v62 = vld [vmem:[%s2008_s4] ss:$0 sm:$0xff]  ;;  %s1230_s16 = sshll.u32 %s301_s13, 4  ;;  %p2025_p1 = scmp.ne.s32.totalorder %s2016_s11, 0  ;;  %s1963_s16 = int_to_ptr.vmem [resolvable:$true] %s1230_s16 }
  0x5c   : > { %1395 = vmatmul.mubr.msk.f32.vlgmr.msra.gmra.mrb[2].mxu1 %vm313_vm2, %v307_v6  ;;  %1474 = vmatprep.subr.bf16.mxu0 %v1702_v12  ;;  %v1130_v6 = vld [vmem:[#allocation7 + $0x50] sm:$0xff]  ;;  %s1622_s23 = scalar_lea.vmem %s1963_s16, 64  ;;  %s1703_s28 = smov [#allocation9]  }
  0x5d   : > { %1403 = vmatpush3.msk.msra.mxu1 %vm317_vm1, %v551_v7  ;;  %1404 = vmatprep.mubr.msk.f32.mxu1 %vm1701_vm0, %v1700_v0  ;;  %v1131_v7 = vld [vmem:[#allocation7 + $0x58] sm:$0xff]  ;;  %p1623_p12 = scmp.ne.s32.totalorder %s1963_s16, %s1622_s23  ;;  %s1626_s29 = sshll.u32 %s1703_s28, 4  ;;  %s1627_s29 = int_to_ptr.vmem [resolvable:$false] %s1626_s29 }
  0x5e   : > { %1471 = vmatprep.subr.bf16.mxu1 %v1702_v12  ;;  %v1496_v10 = vpack.c.bf16 %v1131_v7, %v1130_v6  ;;  %s1628_s8 = scalar_lea.vmem %s1627_s29, 128  ;;  %p1629_p4 = scmp.lt.s32.totalorder %s1963_s16, %s1627_s29 }
  0x5f   : > { %p1624_p2 = pnand %p1623_p12, %p2025_p1  ;;  %p1630_p7 = scmp.lt.s32.totalorder %s1628_s8, %s1622_s23 }
  0x60   : > { %1405 = vmatmul.mubr.msk.f32.vlgmr.msra.gmra.mrb[4].mxu1 %vm313_vm2, %v1329_v8 }
  0x61   : > { %1418 = vmatprep.mubr.msk.f32.mxu1 %vm1701_vm0, %v1700_v0  ;;  %1473 = vmatpush3.bf16.msra.mxu1 %v1472_v15  ;;  %p1625_p3 = pneg %p1624_p2  ;;  %p1631_p8 = por %p1630_p7, %p1629_p4 }
  0x62   : > { %1477 = vmatprep.subr.bf16.mxu1 %v1702_v12 }
  0x63   : > { %p1632_p11 = pnand %p1631_p8, %p1625_p3 }
 0x12b   : > { %v387_v16 = vpop.f32.mrb[0].mxu1  ;;  %v543_v18 = vpop.f32.mrb[0].mxu0 }
 0x12c   : > { %v1391_v17 = vpop.f32.mrb[1].mxu1  ;;  %v1401_v20 = vpop.f32.mrb[1].mxu0 }
 0x12f   : > { %v463_v19 = vpop.f32.mrb[2].mxu1 }
 0x130   : > { %v464_v21 = vadd.f32 %v463_v19, %v387_v16  ;;  %v1396_v22 = vpop.f32.mrb[3].mxu1  ;;  %v1347_v19 = vld [vmem:[%s2010_s6] ss:$0 sm:$0xff] }
 0x132   : > { %v547_v23 = vadd.f32 %v543_v18, %v464_v21 }
 0x133   : > { %v624_v24 = vpop.f32.mrb[4].mxu1 }
 0x134   : > { %v628_v26 = vadd.f32 %v624_v24, %v547_v23  ;;  %v1406_v27 = vpop.f32.mrb[5].mxu1 }
 0x136   : > { %v636_v28 = vadd.f32 %v1332_v25, %v628_v26 }
 0x138   : > { %v637_v29 = vmax.f32 %v636_v28, 0.0 }
 0x13a   : > { %642 = vst.msk [vmem:[#allocation2 + $0x1] sm:$0xff] %vm638_vm3, %v637_v29 }
 0x141   : > { %v647_v36 = vld [vmem:[#allocation2 + $0x1] ss:$2 sm:$0xf]  ;;  %v643_v37 = vld [vmem:[#allocation2] ss:$2 sm:$0xf] }
 0x142   : > { %1412 = vmatmul.mubr.msk.f32.vlgmr.msra.gmra.mrb[2].mxu0 %vm638_vm3, %v647_v36  ;;  %1419 = vmatmul.mubr.msk.f32.vlgmr.msra.gmra.mrb[6].mxu1 %vm638_vm3, %v643_v37  ;;  %v798_v38 = vld [vmem:[#allocation2 + $0x2] ss:$2 sm:$0xf]  ;;  %v877_v39 = vld [vmem:[#allocation2 + $0x3] ss:$2 sm:$0xf] }
 0x143   : > { %1476 = vmatpush3.bf16.msra.mxu0 %v1475_v34  ;;  %1479 = vmatpush3.bf16.msra.mxu1 %v1478_v35 }
 0x144   : > { %1425 = vmatprep.mubr.msk.f32.mxu0 %vm1701_vm0, %v1700_v0  ;;  %1432 = vmatprep.mubr.msk.f32.mxu1 %vm1701_vm0, %v1700_v0 }
 0x145   : > { %1480 = vmatprep.subr.bf16.mxu0 %v1702_v12  ;;  %1486 = vmatprep.subr.bf16.mxu1 %v1702_v12 }
 0x146   : > { %1426 = vmatmul.mubr.msk.f32.vlgmr.msra.gmra.mrb[4].mxu0 %vm638_vm3, %v798_v38  ;;  %1433 = vmatmul.mubr.msk.f32.vlgmr.msra.gmra.mrb[8].mxu1 %vm638_vm3, %v877_v39 }
 0x147   : > { %1443 = vmatprep.mubr.msk.f32.mxu0 %vm1701_vm0, %v1700_v0  ;;  %1454 = vmatprep.mubr.msk.f32.mxu1 %vm1701_vm0, %v1700_v0 }
 0x148   : > { %1482 = vmatpush3.bf16.msra.mxu0 %v1481_v42  ;;  %1488 = vmatpush3.bf16.msra.mxu1 %v1487_v45 }
 0x149   : > { %1483 = vmatprep.subr.bf16.mxu0 %v1702_v12  ;;  %1489 = vmatprep.subr.bf16.mxu1 %v1702_v12 }
 0x14c   : > { %1485 = vmatpush3.bf16.msra.mxu0 %v1484_v49  ;;  %1491 = vmatpush3.bf16.msra.mxu1 %v1490_v51 }
 0x14d   : > { %1492 = vmatprep.subr.bf16.mxu0 %v1702_v12 }
 0x215   : > { %v720_v52 = vpop.f32.mrb[2].mxu0  ;;  %v793_v53 = vpop.f32.mrb[6].mxu1 }
 0x216   : > { %v794_v54 = vadd.f32 %v793_v53, %v720_v52  ;;  %v1413_v55 = vpop.f32.mrb[3].mxu0  ;;  %v1420_v56 = vpop.f32.mrb[7].mxu1 }
 0x219   : > { %v871_v57 = vpop.f32.mrb[4].mxu0  ;;  %v950_v58 = vpop.f32.mrb[8].mxu1 }
 0x21a   : > { %v875_v59 = vadd.f32 %v871_v57, %v794_v54  ;;  %v1427_v60 = vpop.f32.mrb[5].mxu0  ;;  %v1434_v61 = vpop.f32.mrb[9].mxu1 }
 0x21c   : > { %v954_v63 = vadd.f32 %v950_v58, %v875_v59 }
 0x21e   : > { %v962_v1 = vadd.f32 %v1343_v62, %v954_v63 }
 0x220   : > { %v963_v2 = vmax.f32 %v962_v1, 0.0 }
 0x222   : > { %967 = vst.msk [vmem:[#allocation3 + $0x1] sm:$0xf] %vm966_vm6, %v963_v2 }
 0x229   : > { %v973_v8 = vld [vmem:[#allocation3 + $0x1] sm:$0xf] }
 0x22a   : > { %v968_v9 = vld [vmem:[#allocation3] sm:$0xf]  ;;  %1444 = vmatmul.mubr.msk.f32.vlgmr.msra.gmra.mrb[6].mxu0 %vm979_vm7, %v973_v8 }
 0x22b   : > { %1455 = vmatmul.mubr.msk.f32.vlgmr.msra.gmra.mrb[10].mxu1 %vm979_vm7, %v968_v9  ;;  %1494 = vmatpush3.bf16.msra.mxu0 %v1493_v5  ;;  %v1126_v11 = vld [vmem:[#allocation3 + $0x2] sm:$0xf] }
 0x22c   : > { %1465 = vmatprep.mubr.msk.f32.mxu0 %vm1701_vm0, %v1700_v0  ;;  %1495 = vmatprep.subr.bf16.mxu0 %v1702_v12 }
 0x22f   : > { %1497 = vmatpush3.bf16.msra.mxu0 %v1496_v10 }
 0x232   : > { %1466 = vmatmul.mubr.msk.f32.vlgmr.msra.gmra.mrb[8].mxu0 %vm979_vm7, %v1126_v11 }
 0x2fd   : > { %v1049_v13 = vpop.f32.mrb[6].mxu0 }
 0x2fe   : > { %v1122_v14 = vpop.f32.mrb[10].mxu1  ;;  %v1445_v16 = vpop.f32.mrb[7].mxu0 }
 0x2ff   : > { %v1123_v15 = vadd.f32 %v1122_v14, %v1049_v13  ;;  %v1456_v17 = vpop.f32.mrb[11].mxu1 }
 0x305   : > { %v1201_v18 = vpop.f32.mrb[8].mxu0 }
 0x306   : > { %v1205_v0 = vadd.f32 %v1201_v18, %v1123_v15  ;;  %v1467_v20 = vpop.f32.mrb[9].mxu0 }
 0x308   : > { %v1213_v12 = vadd.f32 %v1347_v19, %v1205_v0 }
 0x30a   : > { %v1214_v21 = vmax.f32 %v1213_v12, 0.0 }
 0x30c   : > { %1215 = vst.msk [vmem:[%s301_s13] sm:$0xf] %vm966_vm6, %v1214_v21 }
 0x30d   : > { %1635 = shalt.err (!%p1632_p11)
}
 0x30e   : > { %s1636_s9 = scalar_lea.hbm %s1961_s21, 64  ;;  %s1640_s14 = scalar_lea.hbm %s2011_s7, 128 }
 0x30f   : > { %p1637_p13 = scmp.ne.s32.totalorder %s1961_s21, %s1636_s9  ;;  %p1641_p6 = scmp.lt.u32.totalorder %s1961_s21, %s2011_s7 }
 0x310   : > { %p1642_p9 = scmp.lt.u32.totalorder %s1640_s14, %s1636_s9  ;;  %p1644_p12 = scmp.lt.u32.totalorder %s1636_s9, %s1961_s21 }
 0x311   : > { %p1638_p0 = pnand %p1637_p13, %p2025_p1 }
 0x312   : > { %p1643_p10 = por %p1642_p9, %p1641_p6 }
 0x313   : > { %p1639_p5 = pneg %p1638_p0 }
 0x314   : > { %p1645_p2 = por %p1644_p12, %p1643_p10 }
 0x316   : > { %p1646_p3 = pnand %p1645_p2, %p1639_p5 }
 0x318   : > { %1649 = shalt.err (!%p1646_p3)
}
 0x319   : > { %1507 = dma.vmem_to_hbm [thread:$0]  (%p2025_p1), %s1963_s16, 64, %s1961_s21, %s1217_s22  }
 0x31a PF: > { %p1524_p4 = scmp.ge.s32.totalorder %s1692_s27, 2  ;;  %s1242_s13 = sand.u32 1, %s1680_s24  }
 0x31b   : > { %p2026_p7 = scmp.ne.s32.totalorder %s2017_s12, 0  ;;  %s1243_s18 = scalar_lea.sflag [#allocation6], %s1242_s13 }
 0x31d   : > { %p1517_p8 = pnand %p1524_p4, %p2026_p7 }
 0x31f   : > { %1675 = dma.done.wait (!%p1517_p8), %s1243_s18, 64  }
 0x320   : > { %1677 = vsyncadd (!%p1517_p8), %s1243_s18, 4294967232  ;;  %s2027_s20 = sld [smem:[#allocation13_spill]]  ;;  %p19_p11 = scmp.ge.s32.totalorder %s1769_s30, 4  }
 0x321   : > { %s2028_s24 = smov %s1684_s25  ;;  %s2029_s25 = smov %s1688_s26 }
 0x322   : > { %s2031_s27 = smov %s1769_s30  ;;  %21 = sbr.rel (!%p19_p11) target bundleno = 5 (0x5), region = 106 }
 0x326   : > { %s2030_s26 = smov %s2027_s20 }
 0x329   :  { %1248 = vsyncpa [#allocation5], 1 }
 0x32a   :  { %1250 = vsyncpa [#allocation5 + $0x1], 1 }
 0x32b   :  { %1251 = vsyncpa [#allocation8], 1 }
 0x32c   :  { %1252 = vsyncpa [#allocation6], 1 }
 0x32d   :  { %1254 = vsyncpa [#allocation6 + $0x1], 1 }

</bundles_post_ra>
